<compile_context>
chip_gen: v5e
topology: v5e:2x2
jax: 0.10.0
libtpu: 0.0.40
codegen_flags: <defaults>
</compile_context>

<pallas_src>
import functools

import jax
import jax.numpy as jnp
from jax.experimental import pallas as pl
from jax.experimental.pallas import tpu as pltpu

HIDDEN = 64
HIDDEN_PAD = 128        # pad hidden 64 -> 128 lanes; zeros keep the math bit-exact
TM_DEFAULT = 4096       # batch tile: big enough to amortize ~0.35us/step, small
                        # enough for v7x's 32 MiB scoped VMEM after 32->128 lane pad


def _round_up(n, m):
    return ((n + m - 1) // m) * m


def _critic_kernel(x_ref, w1_ref, b1_ref, w2_ref, b2_ref, o_ref):
    # x tile: (TM, obs_dim); weights are VMEM-resident across all grid steps.
    x = x_ref[...]
    # Linear(obs_dim, 64) on the MXU (hidden padded to 128 for full-lane vregs).
    h = jnp.dot(x, w1_ref[...], preferred_element_type=jnp.float32)   # (TM, 128)
    h = jnp.tanh(h + b1_ref[...])                                     # VPU add + EUP tanh
    # Linear(64, 1): N=1 matmul is pure MXU latency -> do VPU mul + lane reduce instead.
    v = jnp.sum(h * w2_ref[...], axis=-1, keepdims=True) + b2_ref[...]  # (TM, 1)
    o_ref[...] = v.astype(o_ref.dtype)


@functools.partial(jax.jit, static_argnames=("tm_max",))
def ppo_critic_forward(x, w1, b1, w2, b2, *, tm_max=TM_DEFAULT):
    """x: (B, obs_dim) f32 (bf16 also fine). Returns value estimates (B, 1) f32."""
    B, obs_dim = x.shape

    # Zero-pad the hidden dimension 64 -> 128 (exact: tanh(0)=0 and padded w2 rows are 0).
    w1p = jnp.pad(w1, ((0, 0), (0, HIDDEN_PAD - HIDDEN)))             # (obs_dim, 128)
    b1p = jnp.pad(b1.reshape(1, HIDDEN), ((0, 0), (0, HIDDEN_PAD - HIDDEN)))  # (1, 128)
    w2row = jnp.pad(w2.reshape(HIDDEN, 1).T, ((0, 0), (0, HIDDEN_PAD - HIDDEN)))  # (1, 128)
    b2p = b2.reshape(1, 1)

    # Batch tile: multiple of 8 sublanes (or the full batch when it fits in one tile).
    if B <= tm_max:
        tm = max(_round_up(B, 8), 8)
    else:
        tm = tm_max
    num_tiles = pl.cdiv(B, tm)
    b_pad = num_tiles * tm
    if b_pad != B:
        x = jnp.pad(x, ((0, b_pad - B), (0, 0)))   # ragged batch -> tile multiple

    out = pl.pallas_call(
        _critic_kernel,
        out_shape=jax.ShapeDtypeStruct((b_pad, 1), jnp.float32),
        grid=(num_tiles,),
        in_specs=[
            pl.BlockSpec((tm, obs_dim), lambda i: (i, 0)),         # x: streamed per tile
            pl.BlockSpec((obs_dim, HIDDEN_PAD), lambda i: (0, 0)),  # w1: VMEM-resident
            pl.BlockSpec((1, HIDDEN_PAD), lambda i: (0, 0)),        # b1
            pl.BlockSpec((1, HIDDEN_PAD), lambda i: (0, 0)),        # w2 (as row)
            pl.BlockSpec((1, 1), lambda i: (0, 0)),                 # b2
        ],
        out_specs=pl.BlockSpec((tm, 1), lambda i: (i, 0)),
        compiler_params=pltpu.CompilerParams(
            dimension_semantics=("parallel",),   # megacore-shard the batch axis on v7x
        ),
    )(x, w1p, b1p, w2row, b2p)

    return out[:B] if b_pad != B else out


def init_params(obs_dim, key):
    """Deterministic init mimicking torch.nn.Linear's U(-1/sqrt(fan_in), 1/sqrt(fan_in))."""
    k1, k2, k3, k4 = jax.random.split(key, 4)
    lim1 = 1.0 / jnp.sqrt(jnp.float32(obs_dim))
    lim2 = 1.0 / jnp.sqrt(jnp.float32(HIDDEN))
    # Weights stored as (in_features, out_features) so the forward does x @ W.
    w1 = jax.random.uniform(k1, (obs_dim, HIDDEN), jnp.float32, -lim1, lim1)
    b1 = jax.random.uniform(k2, (1, HIDDEN), jnp.float32, -lim1, lim1)
    w2 = jax.random.uniform(k3, (HIDDEN, 1), jnp.float32, -lim2, lim2)
    b2 = jax.random.uniform(k4, (1, 1), jnp.float32, -lim2, lim2)
    return w1, b1, w2, b2


def reference_forward(x, w1, b1, w2, b2):
    h = jnp.tanh(x @ w1 + b1)
    return h @ w2 + b2


if __name__ == "__main__":
    key = jax.random.PRNGKey(0)
    k_x, k_x2, k_p = jax.random.split(key, 3)

    batch, obs_dim = 8, 32
    w1, b1, w2, b2 = init_params(obs_dim, k_p)

    # Case 1: small batch, single tile.
    x = jax.random.normal(k_x, (batch, obs_dim), jnp.float32)
    out = jax.block_until_ready(ppo_critic_forward(x, w1, b1, w2, b2))
    ref = reference_forward(x, w1, b1, w2, b2)
    assert out.shape == (batch, 1), out.shape
    assert jnp.allclose(out, ref, atol=1e-5, rtol=1e-5), (out, ref)

    # Case 2: ragged batch exercising the multi-tile grid + padding path.
    batch2 = 200
    x2 = jax.random.normal(k_x2, (batch2, obs_dim), jnp.float32)
    out2 = jax.block_until_ready(ppo_critic_forward(x2, w1, b1, w2, b2, tm_max=64))
    ref2 = reference_forward(x2, w1, b1, w2, b2)
    assert out2.shape == (batch2, 1), out2.shape
    assert jnp.allclose(out2, ref2, atol=1e-5, rtol=1e-5)

    print("KERNEL_OK")
</pallas_src>

<mosaic_0001>
module attributes {stable_mosaic.version = 11 : i64} {
  func.func @_critic_kernel(%arg0: i32, %arg1: memref<8x32xf32, #tpu.memory_space<vmem>>, %arg2: memref<32x128xf32, #tpu.memory_space<vmem>>, %arg3: memref<1x128xf32, #tpu.memory_space<vmem>>, %arg4: memref<1x128xf32, #tpu.memory_space<vmem>>, %arg5: memref<1x1xf32, #tpu.memory_space<vmem>>, %arg6: memref<8x1xf32, #tpu.memory_space<vmem>>) attributes {dimension_semantics = [#tpu.dimension_semantics<parallel>], iteration_bounds = array<i64: 1>, scalar_prefetch = 0 : i64, scratch_operands = 0 : i64, tpu.core_type = #tpu.core_type<tc>, window_params = [{transform_indices = @transform_0, window_bounds = array<i64: 8, 32>}, {pipeline_mode = #tpu.pipeline_mode<synchronous>, transform_indices = @transform_1, window_bounds = array<i64: 32, 128>}, {pipeline_mode = #tpu.pipeline_mode<synchronous>, transform_indices = @transform_2, window_bounds = array<i64: 1, 128>}, {pipeline_mode = #tpu.pipeline_mode<synchronous>, transform_indices = @transform_3, window_bounds = array<i64: 1, 128>}, {pipeline_mode = #tpu.pipeline_mode<synchronous>, transform_indices = @transform_4, window_bounds = array<i64: 1, 1>}, {transform_indices = @transform_5, window_bounds = array<i64: 8, 1>}]} {
    %c0 = arith.constant 0 : index
    %c0_0 = arith.constant 0 : index
    %0 = vector.load %arg1[%c0, %c0_0] : memref<8x32xf32, #tpu.memory_space<vmem>>, vector<8x32xf32>
    %c0_1 = arith.constant 0 : index
    %c0_2 = arith.constant 0 : index
    %1 = vector.load %arg2[%c0_1, %c0_2] : memref<32x128xf32, #tpu.memory_space<vmem>>, vector<32x128xf32>
    %cst = arith.constant dense<0.000000e+00> : vector<8x128xf32>
    %2 = tpu.matmul %0, %1, %cst {dimension_numbers = #tpu.dot_dimension_numbers<[1], [0], [0], [1], [0, 0, 1, 1], [], []>} : vector<8x32xf32>, vector<32x128xf32>, vector<8x128xf32> -> vector<8x128xf32>
    %c0_3 = arith.constant 0 : index
    %c0_4 = arith.constant 0 : index
    %3 = vector.load %arg3[%c0_3, %c0_4] : memref<1x128xf32, #tpu.memory_space<vmem>>, vector<1x128xf32>
    %4 = vector.broadcast %3 : vector<1x128xf32> to vector<8x128xf32>
    %5 = arith.addf %2, %4 : vector<8x128xf32>
    %6 = math.tanh %5 : vector<8x128xf32>
    %c0_5 = arith.constant 0 : index
    %c0_6 = arith.constant 0 : index
    %7 = vector.load %arg4[%c0_5, %c0_6] : memref<1x128xf32, #tpu.memory_space<vmem>>, vector<1x128xf32>
    %8 = vector.broadcast %7 : vector<1x128xf32> to vector<8x128xf32>
    %9 = arith.mulf %6, %8 : vector<8x128xf32>
    %cst_7 = arith.constant dense<0.000000e+00> : vector<8xf32>
    %10 = vector.multi_reduction <add>, %9, %cst_7 [1] : vector<8x128xf32> to vector<8xf32>
    %11 = vector.shape_cast %10 : vector<8xf32> to vector<8x1xf32>
    %c0_8 = arith.constant 0 : index
    %c0_9 = arith.constant 0 : index
    %12 = vector.load %arg5[%c0_8, %c0_9] : memref<1x1xf32, #tpu.memory_space<vmem>>, vector<1x1xf32>
    %13 = vector.broadcast %12 : vector<1x1xf32> to vector<8x1xf32>
    %14 = arith.addf %11, %13 : vector<8x1xf32>
    %c0_10 = arith.constant 0 : index
    %c0_11 = arith.constant 0 : index
    %15 = vector.load %arg6[%c0_10, %c0_11] : memref<8x1xf32, #tpu.memory_space<vmem>>, vector<8x1xf32>
    tpu.vector_store %arg6[%c0_10, %c0_11], %14 {strides = array<i32>} : memref<8x1xf32, #tpu.memory_space<vmem>>, vector<8x1xf32>,
    return
  }
  func.func @transform_0(%arg0: i32) -> (i32, i32) {
    %c0_i32 = arith.constant 0 : i32
    %c0_i32_0 = arith.constant 0 : i32
    return %arg0, %c0_i32 : i32, i32
  }
  func.func @transform_1(%arg0: i32) -> (i32, i32) {
    %c0_i32 = arith.constant 0 : i32
    %c0_i32_0 = arith.constant 0 : i32
    %c0_i32_1 = arith.constant 0 : i32
    return %c0_i32, %c0_i32_0 : i32, i32
  }
  func.func @transform_2(%arg0: i32) -> (i32, i32) {
    %c0_i32 = arith.constant 0 : i32
    %c0_i32_0 = arith.constant 0 : i32
    %c0_i32_1 = arith.constant 0 : i32
    return %c0_i32, %c0_i32_0 : i32, i32
  }
  func.func @transform_3(%arg0: i32) -> (i32, i32) {
    %c0_i32 = arith.constant 0 : i32
    %c0_i32_0 = arith.constant 0 : i32
    %c0_i32_1 = arith.constant 0 : i32
    return %c0_i32, %c0_i32_0 : i32, i32
  }
  func.func @transform_4(%arg0: i32) -> (i32, i32) {
    %c0_i32 = arith.constant 0 : i32
    %c0_i32_0 = arith.constant 0 : i32
    %c0_i32_1 = arith.constant 0 : i32
    return %c0_i32, %c0_i32_0 : i32, i32
  }
  func.func @transform_5(%arg0: i32) -> (i32, i32) {
    %c0_i32 = arith.constant 0 : i32
    %c0_i32_0 = arith.constant 0 : i32
    return %arg0, %c0_i32 : i32, i32
  }
}

</mosaic_0001>

<bundles_post_ra>
// kernel: ppo_critic_forward.1
= control target key start
LH: loop header
LB: loop body
LE: loop exit
PB: predicated region body
PF: predicated region fallthrough
CT: control target
= control target key end

     0   :  { %vm31_vm0 = vcmask 261120   ;;  %vm68_vm1 = vcmask 7168   ;;  %s137_s1 = inlined_call_operand.vmem [shape: f32[32,128], index: 1, kind: input, shape index: {}]   ;;  %s138_s2 = inlined_call_operand.vmem [shape: f32[1,128], index: 2, kind: input, shape index: {}]   ;;  %s139_s0 = inlined_call_operand.vmem [shape: f32[8,32], index: 0, kind: input, shape index: {}]   ;;  %s140_s3 = inlined_call_operand.vmem [shape: f32[1,128], index: 3, kind: input, shape index: {}]   ;;  %s141_s4 = inlined_call_operand.<no memory space> [shape: f32[1,1], index: 4, kind: input, shape index: {}]   ;;  %s142_s5 = inlined_call_operand.vmem [shape: f32[8,1], index: 5, kind: output, shape index: {}]  }
   0x1   :  { %v26_v0 = vld [vmem:[%s137_s1 + $0x18] sm:$0xff]  ;;  %v25_v1 = vld [vmem:[%s137_s1 + $0x10] sm:$0xff]  ;;  %v24_v2 = vld [vmem:[%s137_s1 + $0x8] sm:$0xff]  ;;  %v10_v5 = vstv %s141_s4 }
   0x2   :  { %47 = vmatpush.msra.mxu0 %v26_v0  ;;  %v23_v3 = vld [vmem:[%s137_s1] sm:$0xff]  ;;  %11 = vst [vmem:[#allocation2] sm:$0x1] %v10_v5 }
   0x3   :  { %v22_v4 = vld [vmem:[%s139_s0] sm:$0xff] }
   0x4   :  { %48 = vmatpush.msra.mxu0 %v25_v1  ;;  %v75_v6 = vld [vmem:[%s138_s2] ss:$0 sm:$0xff] }
   0x5   :  { %v76_v9 = vld [vmem:[%s140_s3] ss:$0 sm:$0xff] }
   0x6   :  { %49 = vmatpush.msra.mxu0 %v24_v2 }
   0x8   :  { %50 = vmatpush.msra.mxu0 %v23_v3 }
   0x9   :  { %74 = vmatmul.msk.f32.vlgmr.msra.gmra.mxu0 %vm31_vm0, %v22_v4  ;;  %v77_v12 = vld [vmem:[#allocation2] ss:$0 sm:$0xff] }
  0x86   :  { %v52_v7 = vpop.f32.mrf.mxu0 }
  0x87   :  { %v53_v8 = vadd.f32 %v75_v6, %v52_v7 }
  0x89   :  { %78 = vtanh.f32 %v53_v8 }
  0x8f   :  { %v79_v10 = vpop.eup %78 }
  0x90   :  { %v60_v11 = vmul.f32 %v79_v10, %v76_v9 }
  0x92   :  { %61 = vadd.xlane.f32.xlu0 %v60_v11 }
 0x105   :  { %v62_v13 = vpop.xlane.xlu0 %61 }
 0x106   :  { %v67_v14 = vadd.f32 %v77_v12, %v62_v13 }
 0x108   :  { %69 = vst.msk [vmem:[%s142_s5] sm:$0xff] %vm68_vm1, %v67_v14 }

</bundles_post_ra>
